<compile_context>
chip_gen: v5e
topology: v5e:2x2
jax: 0.10.0
libtpu: 0.0.40
codegen_flags: <defaults>
</compile_context>

<pallas_src>
import functools

import jax
import jax.numpy as jnp
from jax.experimental import pallas as pl
from jax.experimental.pallas import tpu as pltpu

MAX_INPUT_ID = int(1e9)

# Tile ceilings chosen to fit comfortably in VMEM on v5e/v6e (128 MiB) and v7x (64 MiB):
# double-buffered bf16 input tiles + f32 accumulator stay well under a few MiB.
TM_MAX, TN_MAX, TK_MAX = 256, 256, 512
LN_TM_MAX = 512


def _round_up(x, m):
    return (x + m - 1) // m * m


# ---------------------------------------------------------------------------
# Tiled linear kernel: y = act(x @ w + b) [+ residual]
# ---------------------------------------------------------------------------
def _linear_kernel(x_ref, w_ref, b_ref, *rest, act, has_residual):
    if has_residual:
        r_ref, o_ref, acc_ref = rest
    else:
        o_ref, acc_ref = rest
    k = pl.program_id(2)

    @pl.when(k == 0)
    def _():
        acc_ref[...] = jnp.zeros_like(acc_ref)

    acc_ref[...] += jnp.dot(x_ref[...], w_ref[...],
                            preferred_element_type=jnp.float32)

    @pl.when(k == pl.num_programs(2) - 1)
    def _():
        y = acc_ref[...] + b_ref[...]
        if act == "quick_gelu":          # CLIP hidden_act='quick_gelu'
            y = y * jax.nn.sigmoid(1.702 * y)
        elif act == "gelu":              # nn.GELU() default = exact erf
            y = jax.nn.gelu(y, approximate=False)
        if has_residual:
            y = y + r_ref[...].astype(jnp.float32)
        o_ref[...] = y.astype(o_ref.dtype)


def fused_linear(x, w, b, residual=None, act="none", out_dtype=jnp.bfloat16):
    """x: (M, K), w: (K, N), b: (N,), residual: (M, N) or None -> (M, N)."""
    M, K = x.shape
    N = w.shape[1]
    x = x.astype(jnp.bfloat16)
    w = w.astype(jnp.bfloat16)
    b = b.astype(jnp.float32).reshape(1, N)

    tm = min(TM_MAX, _round_up(M, 8))
    tn = min(TN_MAX, _round_up(N, 128))
    tk = min(TK_MAX, _round_up(K, 128))
    Mp, Np, Kp = _round_up(M, tm), _round_up(N, tn), _round_up(K, tk)

    xp = jnp.pad(x, ((0, Mp - M), (0, Kp - K)))
    wp = jnp.pad(w, ((0, Kp - K), (0, Np - N)))
    bp = jnp.pad(b, ((0, 0), (0, Np - N)))

    inputs = [xp, wp, bp]
    in_specs = [
        pl.BlockSpec((tm, tk), lambda i, j, k: (i, k)),
        pl.BlockSpec((tk, tn), lambda i, j, k: (k, j)),
        pl.BlockSpec((1, tn), lambda i, j, k: (0, j)),
    ]
    has_residual = residual is not None
    if has_residual:
        rp = jnp.pad(residual.astype(jnp.bfloat16), ((0, Mp - M), (0, Np - N)))
        inputs.append(rp)
        in_specs.append(pl.BlockSpec((tm, tn), lambda i, j, k: (i, j)))

    grid = (Mp // tm, Np // tn, Kp // tk)
    cost = pl.CostEstimate(
        flops=2 * Mp * Np * Kp,
        transcendentals=0,
        bytes_accessed=(Mp * Kp + Kp * Np) * 2 + Mp * Np * 4,
    )

    out = pl.pallas_call(
        functools.partial(_linear_kernel, act=act, has_residual=has_residual),
        out_shape=jax.ShapeDtypeStruct((Mp, Np), out_dtype),
        grid=grid,
        in_specs=in_specs,
        out_specs=pl.BlockSpec((tm, tn), lambda i, j, k: (i, j)),
        scratch_shapes=[pltpu.VMEM((tm, tn), jnp.float32)],
        compiler_params=pltpu.CompilerParams(
            dimension_semantics=("parallel", "parallel", "arbitrary")),
        cost_estimate=cost,
    )(*inputs)
    return out[:M, :N]


# ---------------------------------------------------------------------------
# Fused LayerNorm + linear kernel: y = act(LN(x) @ w + b)   (full-K per tile)
# ---------------------------------------------------------------------------
def _ln_linear_kernel(x_ref, g_ref, bln_ref, w_ref, b_ref, o_ref, *, act, eps):
    x = x_ref[...].astype(jnp.float32)
    mu = jnp.mean(x, axis=-1, keepdims=True)
    xc = x - mu
    var = jnp.mean(xc * xc, axis=-1, keepdims=True)
    xn = xc * jax.lax.rsqrt(var + eps)
    xn = xn * g_ref[...] + bln_ref[...]
    y = jnp.dot(xn.astype(jnp.bfloat16), w_ref[...],
                preferred_element_type=jnp.float32)
    y = y + b_ref[...]
    if act == "quick_gelu":
        y = y * jax.nn.sigmoid(1.702 * y)
    elif act == "gelu":
        y = jax.nn.gelu(y, approximate=False)
    o_ref[...] = y.astype(o_ref.dtype)


def fused_ln_linear(x, gamma, beta, w, b, act="none", eps=1e-5,
                    out_dtype=jnp.bfloat16):
    """x: (M, C), w: (C, N) -> (M, N).  LayerNorm over C fused with the matmul."""
    M, C = x.shape
    N = w.shape[1]
    tm = min(TM_MAX, _round_up(M, 8))
    tn = min(TN_MAX, _round_up(N, 128))
    Mp, Np = _round_up(M, tm), _round_up(N, tn)

    xp = jnp.pad(x.astype(jnp.bfloat16), ((0, Mp - M), (0, 0)))
    wp = jnp.pad(w.astype(jnp.bfloat16), ((0, 0), (0, Np - N)))
    bp = jnp.pad(b.astype(jnp.float32).reshape(1, N), ((0, 0), (0, Np - N)))
    g = gamma.astype(jnp.float32).reshape(1, C)
    bt = beta.astype(jnp.float32).reshape(1, C)

    out = pl.pallas_call(
        functools.partial(_ln_linear_kernel, act=act, eps=eps),
        out_shape=jax.ShapeDtypeStruct((Mp, Np), out_dtype),
        grid=(Mp // tm, Np // tn),
        in_specs=[
            pl.BlockSpec((tm, C), lambda i, j: (i, 0)),
            pl.BlockSpec((1, C), lambda i, j: (0, 0)),
            pl.BlockSpec((1, C), lambda i, j: (0, 0)),
            pl.BlockSpec((C, tn), lambda i, j: (0, j)),
            pl.BlockSpec((1, tn), lambda i, j: (0, j)),
        ],
        out_specs=pl.BlockSpec((tm, tn), lambda i, j: (i, j)),
        compiler_params=pltpu.CompilerParams(
            dimension_semantics=("parallel", "parallel")),
    )(xp, g, bt, wp, bp)
    return out[:M, :N]


# ---------------------------------------------------------------------------
# Row-tiled standalone LayerNorm (CLIP pre-layernorm)
# ---------------------------------------------------------------------------
def _layernorm_kernel(x_ref, g_ref, b_ref, o_ref, *, eps):
    x = x_ref[...].astype(jnp.float32)
    mu = jnp.mean(x, axis=-1, keepdims=True)
    xc = x - mu
    var = jnp.mean(xc * xc, axis=-1, keepdims=True)
    y = xc * jax.lax.rsqrt(var + eps)
    o_ref[...] = (y * g_ref[...] + b_ref[...]).astype(o_ref.dtype)


def pallas_layernorm(x, gamma, beta, eps=1e-5, out_dtype=jnp.bfloat16):
    M, C = x.shape
    tm = min(LN_TM_MAX, _round_up(M, 8))
    Mp = _round_up(M, tm)
    xp = jnp.pad(x, ((0, Mp - M), (0, 0)))
    g = gamma.astype(jnp.float32).reshape(1, C)
    bt = beta.astype(jnp.float32).reshape(1, C)
    out = pl.pallas_call(
        functools.partial(_layernorm_kernel, eps=eps),
        out_shape=jax.ShapeDtypeStruct((Mp, C), out_dtype),
        grid=(Mp // tm,),
        in_specs=[
            pl.BlockSpec((tm, C), lambda i: (i, 0)),
            pl.BlockSpec((1, C), lambda i: (0, 0)),
            pl.BlockSpec((1, C), lambda i: (0, 0)),
        ],
        out_specs=pl.BlockSpec((tm, C), lambda i: (i, 0)),
        compiler_params=pltpu.CompilerParams(dimension_semantics=("parallel",)),
    )(xp, g, bt)
    return out[:M, :]


# ---------------------------------------------------------------------------
# Attention: one crop per grid step, all heads in-kernel from a fused QKV block
# ---------------------------------------------------------------------------
def _attn_kernel(qkv_ref, o_ref, *, heads, scale):
    T = qkv_ref.shape[1]
    C = qkv_ref.shape[2] // 3
    hd = C // heads
    qkv = qkv_ref[0]                                  # (T, 3C) bf16, lane-dense
    outs = []
    for h in range(heads):                            # static unroll over heads
        q = qkv[:, h * hd:(h + 1) * hd] * scale       # scale folded into q (T*hd ops)
        k = qkv[:, C + h * hd:C + (h + 1) * hd]
        v = qkv[:, 2 * C + h * hd:2 * C + (h + 1) * hd]
        # contract head dims directly (no k.T materialization)
        s = jax.lax.dot_general(q, k, (((1,), (1,)), ((), ())),
                                preferred_element_type=jnp.float32)   # (T, T) f32
        m = jnp.max(s, axis=-1, keepdims=True)
        p = jnp.exp(s - m)
        denom = jnp.sum(p, axis=-1, keepdims=True)
        o = jnp.dot(p.astype(qkv.dtype), v, preferred_element_type=jnp.float32)
        outs.append(o * pl.reciprocal(denom, approx=True))
    o_ref[0] = jnp.concatenate(outs, axis=-1).astype(o_ref.dtype)     # (T, C) dense


def pallas_attention(qkv, heads, scale):
    """qkv: (N, T, 3C) fused bf16 -> (N, T, C); non-causal softmax attention."""
    N, T, threeC = qkv.shape
    C = threeC // 3
    return pl.pallas_call(
        functools.partial(_attn_kernel, heads=heads, scale=scale),
        out_shape=jax.ShapeDtypeStruct((N, T, C), qkv.dtype),
        grid=(N,),
        in_specs=[pl.BlockSpec((1, T, threeC), lambda i: (i, 0, 0))],
        out_specs=pl.BlockSpec((1, T, C), lambda i: (i, 0, 0)),
        compiler_params=pltpu.CompilerParams(dimension_semantics=("parallel",)),
    )(qkv)


# ---------------------------------------------------------------------------
# Scaled-down config (analogue of CLIP-ViT-L/14-336 + Phi-3-V)
# ---------------------------------------------------------------------------
class Cfg:
    image_size = 32          # stands in for 336
    patch_size = 8           # stands in for 14  -> 4x4 patch grid (24x24 in real model)
    num_channels = 3
    clip_hidden = 64         # image_dim_out (1024 in real model)
    clip_heads = 4
    clip_layers = 2
    clip_intermediate = 128
    layer_norm_eps = 1e-5
    hidden_size = 64         # Phi-3 n_embd
    vocab_size = 100
    layer_idx = -2           # config.img_processor['layer_idx'] default
    # use_hd_transform = with_learnable_separator = True, projection_cls='mlp',
    # hd_transform_order='sub_glb'


# ---------------------------------------------------------------------------
# Parameters (deterministic synthetic init; shapes follow the module __init__)
# Matmul weights stored in bf16 (MXU operands); biases / LN / embeddings in f32.
# ---------------------------------------------------------------------------
def init_params(key, cfg):
    C = cfg.clip_hidden
    P = cfg.patch_size
    n_patches = (cfg.image_size // P) ** 2
    keys = iter(jax.random.split(key, 128))

    def nrm(shape, scale=0.02, dtype=jnp.float32):
        return (scale * jax.random.normal(next(keys), shape)).astype(dtype)

    bf = jnp.bfloat16
    params = dict(
        # CLIPVisionEmbeddings
        class_embedding=nrm((C,)),
        patch_embedding_w=nrm((C, cfg.num_channels, P, P), dtype=bf),   # Conv2d, bias=False
        position_embedding=nrm((n_patches + 1, C)),
        pre_ln_g=jnp.ones((C,), jnp.float32),
        pre_ln_b=jnp.zeros((C,), jnp.float32),
        layers=[],
        # learnable separators (module inits to zeros; random here for a non-trivial test)
        glb_GN=nrm((1, 1, 4 * C)),
        sub_GN=nrm((1, 1, 1, 4 * C)),
        # img_projection: Sequential(Linear(4C, hidden), GELU, Linear(hidden, hidden))
        proj_fc1_w=nrm((4 * C, cfg.hidden_size), dtype=bf),
        proj_fc1_b=nrm((cfg.hidden_size,)),
        proj_fc2_w=nrm((cfg.hidden_size, cfg.hidden_size), dtype=bf),
        proj_fc2_b=nrm((cfg.hidden_size,)),
        # wte (extra row so clamp_max(vocab_size) stays in range, as in the module)
        wte=nrm((cfg.vocab_size + 1, cfg.hidden_size)),
    )
    for _ in range(cfg.clip_layers):
        params["layers"].append(dict(
            ln1_g=jnp.ones((C,), jnp.float32), ln1_b=jnp.zeros((C,), jnp.float32),
            q_w=nrm((C, C), dtype=bf), q_b=nrm((C,)),
            k_w=nrm((C, C), dtype=bf), k_b=nrm((C,)),
            v_w=nrm((C, C), dtype=bf), v_b=nrm((C,)),
            o_w=nrm((C, C), dtype=bf), o_b=nrm((C,)),
            ln2_g=jnp.ones((C,), jnp.float32), ln2_b=jnp.zeros((C,), jnp.float32),
            fc1_w=nrm((C, cfg.clip_intermediate), dtype=bf), fc1_b=nrm((cfg.clip_intermediate,)),
            fc2_w=nrm((cfg.clip_intermediate, C), dtype=bf), fc2_b=nrm((C,)),
        ))
    return params


# ---------------------------------------------------------------------------
# CLIP vision tower (img_processor) -> hidden_states list
# ---------------------------------------------------------------------------
def clip_vision_hidden_states(pixel_values, params, cfg):
    """pixel_values: (N, 3, H, W) NCHW.  Returns hidden_states list (len = layers+1)."""
    N = pixel_values.shape[0]
    P = cfg.patch_size
    G = cfg.image_size // P
    C = cfg.clip_hidden

    # im2col: (N, 3, G, P, G, P) -> (N, G, G, 3, P, P) -> (N*G*G, 3*P*P)
    x = pixel_values.reshape(N, cfg.num_channels, G, P, G, P)
    x = x.transpose(0, 2, 4, 1, 3, 5).reshape(N * G * G, cfg.num_channels * P * P)
    w_patch = params["patch_embedding_w"].reshape(C, -1).T            # (3*P*P, C)
    patch_embeds = fused_linear(x, w_patch, jnp.zeros((C,), jnp.float32),
                                out_dtype=jnp.float32)
    patch_embeds = patch_embeds.reshape(N, G * G, C)

    cls = jnp.broadcast_to(params["class_embedding"].reshape(1, 1, C), (N, 1, C))
    h = jnp.concatenate([cls, patch_embeds], axis=1)                  # (N, T, C) f32
    h = h + params["position_embedding"][None, :, :]
    T = h.shape[1]
    M = N * T

    # pre_layernorm; residual stream kept in bf16 from here on
    h = pallas_layernorm(h.reshape(M, C), params["pre_ln_g"],
                         params["pre_ln_b"], cfg.layer_norm_eps)       # (M, C) bf16

    hidden_states = [h.reshape(N, T, C)]
    heads = cfg.clip_heads
    hd = C // heads
    scale = hd ** -0.5

    for lyr in params["layers"]:
        residual = h
        # LN1 fused with the (fused) QKV projection
        qkv_w = jnp.concatenate([lyr["q_w"], lyr["k_w"], lyr["v_w"]], axis=1)   # (C, 3C)
        qkv_b = jnp.concatenate([lyr["q_b"], lyr["k_b"], lyr["v_b"]], axis=0)   # (3C,)
        qkv = fused_ln_linear(h, lyr["ln1_g"], lyr["ln1_b"], qkv_w, qkv_b,
                              eps=cfg.layer_norm_eps)                  # (M, 3C) bf16
        attn = pallas_attention(qkv.reshape(N, T, 3 * C), heads, scale)  # (N, T, C)
        # out-proj with residual add fused into the epilogue
        h = fused_linear(attn.reshape(M, C), lyr["o_w"], lyr["o_b"],
                         residual=residual)                            # (M, C) bf16

        residual = h
        # LN2 fused with fc1 + quick_gelu
        x2 = fused_ln_linear(h, lyr["ln2_g"], lyr["ln2_b"], lyr["fc1_w"], lyr["fc1_b"],
                             act="quick_gelu", eps=cfg.layer_norm_eps)
        # fc2 with residual add fused into the epilogue
        h = fused_linear(x2, lyr["fc2_w"], lyr["fc2_b"], residual=residual)
        hidden_states.append(h.reshape(N, T, C))

    return hidden_states


# ---------------------------------------------------------------------------
# HD transform glue (pure reshapes / concat), projection runs in Pallas
# ---------------------------------------------------------------------------
def reshape_hd_patches_2x2merge(image_features, h_crop, w_crop):
    N, L, C = image_features.shape
    H = int(round(L ** 0.5))
    assert H * H == L and H % 2 == 0 and N % (h_crop * w_crop) == 0
    num_images = N // (h_crop * w_crop)
    x = image_features.reshape(N, H, H, C)
    x = x.reshape(N, H // 2, 2, H // 2, 2, C)
    x = x.transpose(0, 1, 3, 2, 4, 5)
    x = x.reshape(N, -1, 4 * C)
    x = x.reshape(num_images, h_crop, w_crop, H // 2, H // 2, 4 * C)
    x = x.transpose(0, 1, 3, 2, 4, 5)
    return x.reshape(num_images, h_crop * H // 2, w_crop * H // 2, 4 * C)


def add_image_newline(image_features_hd, sub_GN):
    num_images, h, w, hid = image_features_hd.shape
    newline = jnp.broadcast_to(sub_GN, (num_images, h, 1, hid))
    return jnp.concatenate([image_features_hd, newline], axis=2).reshape(
        num_images, -1, hid)


def hd_feature_transform(image_features, image_sizes, params, cfg):
    """image_features: (num_images, num_crops+1, L, C). hd_transform_order='sub_glb'."""
    dt = image_features.dtype
    sub_GN = params["sub_GN"].astype(dt)
    glb_GN = params["glb_GN"].astype(dt)

    global_image_features = image_features[:, 0]
    glb_hd = reshape_hd_patches_2x2merge(global_image_features, 1, 1)
    glb_hd_newline = add_image_newline(glb_hd, sub_GN)

    all_image_embeddings = []
    for i, (hh, ww) in enumerate(image_sizes):
        h_crop = hh // cfg.image_size
        w_crop = ww // cfg.image_size
        num_crops = h_crop * w_crop
        sub = image_features[i, 1:1 + num_crops]
        sub_hd = reshape_hd_patches_2x2merge(sub, h_crop, w_crop)
        sub_hd_newline = add_image_newline(sub_hd, sub_GN)
        all_image_embeddings.extend(
            [sub_hd_newline[0], glb_GN[0], glb_hd_newline[i]])

    feats = jnp.concatenate(all_image_embeddings, axis=0)      # (tokens, 4*C) bf16
    y = fused_linear(feats, params["proj_fc1_w"], params["proj_fc1_b"], act="gelu")
    y = fused_linear(y, params["proj_fc2_w"], params["proj_fc2_b"],
                     out_dtype=jnp.float32)
    return y


# ---------------------------------------------------------------------------
# Phi3ImageEmbedding.forward
# ---------------------------------------------------------------------------
def phi3_image_embedding_forward(input_ids, pixel_values, image_sizes, params, cfg):
    B, S = input_ids.shape
    ids = input_ids.reshape(-1, S)
    mask = (ids < 0) & (ids > -MAX_INPUT_ID)
    positions = jnp.nonzero(mask)                 # concrete (wrapper is not jitted)
    has_image = int(positions[0].shape[0]) > 0

    ids = jnp.clip(ids, 0, cfg.vocab_size)        # clamp_min_(0).clamp_max_(vocab_size)
    hidden_states = jnp.take(params["wte"], ids, axis=0)       # (B, S, hidden) f32

    if has_image:
        num_images, num_crops, c, h, w = pixel_values.shape
        assert c == cfg.num_channels and h == w == cfg.image_size
        hs = clip_vision_hidden_states(
            pixel_values.reshape(num_images * num_crops, c, h, w), params, cfg)
        img_feature = hs[cfg.layer_idx]           # hidden_states[-2]
        patch_feature = img_feature[:, 1:]        # drop CLS -> 'patch' features
        img_features = patch_feature.reshape(num_images, num_crops, -1, cfg.clip_hidden)
        image_features_proj = hd_feature_transform(img_features, image_sizes, params, cfg)
        hidden_states = hidden_states.at[positions[0], positions[1]].set(
            image_features_proj.astype(hidden_states.dtype))

    # self.drop = nn.Dropout(embd_pdrop): identity in eval mode
    return hidden_states


# ---------------------------------------------------------------------------
if __name__ == "__main__":
    cfg = Cfg()
    key = jax.random.PRNGKey(0)
    pkey, xkey, ikey = jax.random.split(key, 3)
    params = init_params(pkey, cfg)

    # One image of size 64x32 -> h_crop=2, w_crop=1 -> 2 sub-crops + 1 global crop.
    image_sizes = [(2 * cfg.image_size, 1 * cfg.image_size)]
    num_images, num_crops_total = 1, 3
    pixel_values = jax.random.normal(
        xkey, (num_images, num_crops_total, cfg.num_channels,
               cfg.image_size, cfg.image_size), jnp.float32)

    # number of image tokens produced by the HD transform for this image:
    Hh = (cfg.image_size // cfg.patch_size) // 2      # 2
    h_crop, w_crop = 2, 1
    n_img_tokens = (h_crop * Hh) * (w_crop * Hh + 1) + 1 + Hh * (Hh + 1)  # 12 + 1 + 6 = 19

    B, S = 1, 32
    base_ids = jax.random.randint(ikey, (B, S), 0, cfg.vocab_size)
    input_ids = base_ids.at[0, 2:2 + n_img_tokens].set(-1)    # image-placeholder tokens

    out = phi3_image_embedding_forward(input_ids, pixel_values, image_sizes, params, cfg)
    jax.block_until_ready(out)
    assert out.shape == (B, S, cfg.hidden_size)
    assert bool(jnp.all(jnp.isfinite(out)))
    print("KERNEL_OK")
</pallas_src>

<mosaic_0001>
module attributes {stable_mosaic.version = 11 : i64} {
  func.func @_linear_kernel(%arg0: i32, %arg1: i32, %arg2: i32, %arg3: memref<48x256xbf16, #tpu.memory_space<vmem>>, %arg4: memref<256x128xbf16, #tpu.memory_space<vmem>>, %arg5: memref<1x128xf32, #tpu.memory_space<vmem>>, %arg6: memref<48x128xf32, #tpu.memory_space<vmem>>, %arg7: memref<48x128xf32, #tpu.memory_space<vmem>>) attributes {dimension_semantics = [#tpu.dimension_semantics<parallel>, #tpu.dimension_semantics<parallel>, #tpu.dimension_semantics<arbitrary>], iteration_bounds = array<i64: 1, 1, 1>, scalar_prefetch = 0 : i64, scratch_operands = 1 : i64, tpu.core_type = #tpu.core_type<tc>, window_params = [{transform_indices = @transform_0, window_bounds = array<i64: 48, 256>}, {transform_indices = @transform_1, window_bounds = array<i64: 256, 128>}, {transform_indices = @transform_2, window_bounds = array<i64: 1, 128>}, {transform_indices = @transform_3, window_bounds = array<i64: 48, 128>}]} {
    %c0_i32 = arith.constant 0 : i32
    %0 = arith.cmpi eq, %arg2, %c0_i32 : i32
    %1 = arith.extui %0 : i1 to i32
    %c0_i32_0 = arith.constant 0 : i32
    %2 = arith.cmpi ne, %1, %c0_i32_0 : i32
    scf.if %2 {
      %cst_10 = arith.constant 0.000000e+00 : f32
      %12 = vector.broadcast %cst_10 : f32 to vector<48x128xf32>
      %c0_11 = arith.constant 0 : index
      %c0_12 = arith.constant 0 : index
      %13 = vector.load %arg7[%c0_11, %c0_12] : memref<48x128xf32, #tpu.memory_space<vmem>>, vector<48x128xf32>
      tpu.vector_store %arg7[%c0_11, %c0_12], %12 {strides = array<i32>} : memref<48x128xf32, #tpu.memory_space<vmem>>, vector<48x128xf32>,
    } else {
    }
    %c0 = arith.constant 0 : index
    %c0_1 = arith.constant 0 : index
    %3 = vector.load %arg7[%c0, %c0_1] : memref<48x128xf32, #tpu.memory_space<vmem>>, vector<48x128xf32>
    %c0_2 = arith.constant 0 : index
    %c0_3 = arith.constant 0 : index
    %4 = vector.load %arg3[%c0_2, %c0_3] : memref<48x256xbf16, #tpu.memory_space<vmem>>, vector<48x256xbf16>
    %c0_4 = arith.constant 0 : index
    %c0_5 = arith.constant 0 : index
    %5 = vector.load %arg4[%c0_4, %c0_5] : memref<256x128xbf16, #tpu.memory_space<vmem>>, vector<256x128xbf16>
    %cst = arith.constant dense<0.000000e+00> : vector<48x128xf32>
    %6 = tpu.matmul %4, %5, %cst {dimension_numbers = #tpu.dot_dimension_numbers<[1], [0], [0], [1], [0, 0, 1, 1], [], []>} : vector<48x256xbf16>, vector<256x128xbf16>, vector<48x128xf32> -> vector<48x128xf32>
    %7 = arith.addf %3, %6 : vector<48x128xf32>
    %c0_6 = arith.constant 0 : index
    %c0_7 = arith.constant 0 : index
    %8 = vector.load %arg7[%c0_6, %c0_7] : memref<48x128xf32, #tpu.memory_space<vmem>>, vector<48x128xf32>
    tpu.vector_store %arg7[%c0_6, %c0_7], %7 {strides = array<i32>} : memref<48x128xf32, #tpu.memory_space<vmem>>, vector<48x128xf32>,
    %c0_i32_8 = arith.constant 0 : i32
    %9 = arith.cmpi eq, %arg2, %c0_i32_8 : i32
    %10 = arith.extui %9 : i1 to i32
    %c0_i32_9 = arith.constant 0 : i32
    %11 = arith.cmpi ne, %10, %c0_i32_9 : i32
    scf.if %11 {
      %c0_10 = arith.constant 0 : index
      %c0_11 = arith.constant 0 : index
      %12 = vector.load %arg7[%c0_10, %c0_11] : memref<48x128xf32, #tpu.memory_space<vmem>>, vector<48x128xf32>
      %c0_12 = arith.constant 0 : index
      %c0_13 = arith.constant 0 : index
      %13 = vector.load %arg5[%c0_12, %c0_13] : memref<1x128xf32, #tpu.memory_space<vmem>>, vector<1x128xf32>
      %14 = vector.broadcast %13 : vector<1x128xf32> to vector<48x128xf32>
      %15 = arith.addf %12, %14 : vector<48x128xf32>
      %c0_14 = arith.constant 0 : index
      %c0_15 = arith.constant 0 : index
      %16 = vector.load %arg6[%c0_14, %c0_15] : memref<48x128xf32, #tpu.memory_space<vmem>>, vector<48x128xf32>
      tpu.vector_store %arg6[%c0_14, %c0_15], %15 {strides = array<i32>} : memref<48x128xf32, #tpu.memory_space<vmem>>, vector<48x128xf32>,
    } else {
    }
    return
  }
  func.func @transform_0(%arg0: i32, %arg1: i32, %arg2: i32) -> (i32, i32) {
    %c0_i32 = arith.constant 0 : i32
    return %arg0, %arg2 : i32, i32
  }
  func.func @transform_1(%arg0: i32, %arg1: i32, %arg2: i32) -> (i32, i32) {
    %c0_i32 = arith.constant 0 : i32
    return %arg2, %arg1 : i32, i32
  }
  func.func @transform_2(%arg0: i32, %arg1: i32, %arg2: i32) -> (i32, i32) {
    %c0_i32 = arith.constant 0 : i32
    %c0_i32_0 = arith.constant 0 : i32
    return %c0_i32, %arg1 : i32, i32
  }
  func.func @transform_3(%arg0: i32, %arg1: i32, %arg2: i32) -> (i32, i32) {
    %c0_i32 = arith.constant 0 : i32
    return %arg0, %arg1 : i32, i32
  }
}

</mosaic_0001>

<bundles_post_ra>
// kernel: tpu_custom_call.1
= control target key start
LH: loop header
LB: loop body
LE: loop exit
PB: predicated region body
PF: predicated region fallthrough
CT: control target
= control target key end

     0   :  { %8 = vsyncpa [#allocation4], 0  ;;  %s589_s0 = inlined_call_operand.hbm [shape: bf16[48,256], index: 0, kind: input, shape index: {}]   ;;  %s590_s1 = inlined_call_operand.hbm [shape: bf16[256,128], index: 1, kind: input, shape index: {}]   ;;  %s591_s2 = inlined_call_operand.vmem [shape: f32[1,128], index: 2, kind: input, shape index: {}]   ;;  %s592_s3 = inlined_call_operand.hbm [shape: f32[48,128], index: 3, kind: output, shape index: {}]  }
   0x1   :  { %9 = vsyncpa [#allocation7], 0 }
   0x2   :  { %10 = vsyncpa [#allocation5], 0  ;;  %s15_s14 = sshll.u32 %s589_s0, 4  ;;  %s544_s15 = smov [#allocation3]   ;;  %s16_s14 = int_to_ptr.hbm [resolvable:$true] %s15_s14 }
   0x3   :  { %s17_s16 = sshll.u32 %s544_s15, 4  ;;  %s28_s19 = sshll.u32 %s590_s1, 4  ;;  %s18_s16 = int_to_ptr.vmem [resolvable:$true] %s17_s16  ;;  %s29_s19 = int_to_ptr.hbm [resolvable:$true] %s28_s19 }
   0x4   :  { %s545_s20 = smov 128   ;;  %s546_s21 = smov 8  }
   0x5   :  { %23 = dma.hbm_to_vmem [thread:$0]  %s16_s14, 768, %s18_s16, [#allocation4], %s545_s20, %s545_s20, %s546_s21  }
   0x6   :  { %s547_s22 = smov [#allocation6]   ;;  %s548_s24 = smov 64  }
   0x7   :  { %s30_s23 = sshll.u32 %s547_s22, 4  ;;  %s549_s0 = smov 4   ;;  %s31_s23 = int_to_ptr.vmem [resolvable:$true] %s30_s23 }
   0x8   :  { %36 = dma.hbm_to_vmem [thread:$0]  %s29_s19, 2048, %s31_s23, [#allocation7], %s548_s24, %s548_s24, %s549_s0  }
   0x9   :  { %538 = dma.done.wait [#allocation4], 768  }
   0xa   :  { %539 = vsyncadd [#allocation4], 4294966528 }
   0xb   :  { %540 = dma.done.wait [#allocation7], 2048  }
   0xc   :  { %541 = vsyncadd [#allocation7], 4294965248  ;;  %v433_v0 = vld [vmem:[#allocation6 + $0x38] sm:$0xff]  ;;  %v432_v2 = vld [vmem:[#allocation6 + $0x30] sm:$0xff]  ;;  %s318_s29 = sshll.u32 %s592_s3, 4  ;;  %s319_s29 = int_to_ptr.hbm [resolvable:$true] %s318_s29 }
   0xd   :  { %v441_v1 = vld [vmem:[#allocation6 + $0x78] sm:$0xff]  ;;  %442 = vmatpush.bf16.msra.mxu2 %v433_v0  ;;  %v440_v3 = vld [vmem:[#allocation6 + $0x70] sm:$0xff]  ;;  %227 = vmatpush.bf16.msra.mxu0 %v433_v0  ;;  %v431_v4 = vld [vmem:[#allocation6 + $0x28] sm:$0xff] }
   0xe   :  { %450 = vmatpush.bf16.msra.mxu3 %v441_v1  ;;  %251 = vmatpush.bf16.msra.mxu1 %v441_v1  ;;  %v439_v5 = vld [vmem:[#allocation6 + $0x68] sm:$0xff]  ;;  %v430_v6 = vld [vmem:[#allocation6 + $0x20] sm:$0xff]  ;;  %v429_v8 = vld [vmem:[#allocation6 + $0x18] sm:$0xff] }
   0xf   :  { %v438_v7 = vld [vmem:[#allocation6 + $0x60] sm:$0xff]  ;;  %v437_v9 = vld [vmem:[#allocation6 + $0x58] sm:$0xff]  ;;  %v428_v10 = vld [vmem:[#allocation6 + $0x10] sm:$0xff] }
  0x10   :  { %v436_v11 = vld [vmem:[#allocation6 + $0x50] sm:$0xff]  ;;  %v427_v12 = vld [vmem:[#allocation6 + $0x8] sm:$0xff]  ;;  %v426_v14 = vld [vmem:[#allocation6] sm:$0xff] }
  0x11   :  { %443 = vmatpush.bf16.msra.mxu2 %v432_v2  ;;  %228 = vmatpush.bf16.msra.mxu0 %v432_v2  ;;  %v435_v13 = vld [vmem:[#allocation6 + $0x48] sm:$0xff]  ;;  %v434_v15 = vld [vmem:[#allocation6 + $0x40] sm:$0xff]  ;;  %v334_v20 = vld [vmem:[#allocation3] sm:$0xf] }
  0x12   :  { %451 = vmatpush.bf16.msra.mxu3 %v440_v3  ;;  %252 = vmatpush.bf16.msra.mxu1 %v440_v3  ;;  %v342_v16 = vld [vmem:[#allocation3 + $0x10] sm:$0xf]  ;;  %v423_v17 = vld [vmem:[#allocation3 + $0x14] sm:$0xf0]  ;;  %v422_v18 = vld [vmem:[#allocation3 + $0x14] sm:$0xf] }
  0x13   :  { %v344_v19 = vld [vmem:[#allocation3 + $0x18] sm:$0xf0]  ;;  %v421_v21 = vld [vmem:[#allocation3 + $0x4] sm:$0xf0]  ;;  %v420_v22 = vld [vmem:[#allocation3 + $0x4] sm:$0xf]  ;;  %v343_v24 = vor.u32 %v423_v17, %v342_v16 }
  0x14   :  { %v336_v23 = vld [vmem:[#allocation3 + $0x8] sm:$0xf0]  ;;  %v347_v25 = vor.u32 %v422_v18, %v344_v19  ;;  %v335_v26 = vor.u32 %v421_v21, %v334_v20  ;;  %v350_v28 = vld [vmem:[#allocation3 + $0x20] sm:$0xf]  ;;  %v425_v29 = vld [vmem:[#allocation3 + $0x24] sm:$0xf0] }
  0x15   :  { %444 = vmatpush.bf16.msra.mxu2 %v431_v4  ;;  %229 = vmatpush.bf16.msra.mxu0 %v431_v4  ;;  %v339_v27 = vor.u32 %v420_v22, %v336_v23  ;;  %v424_v30 = vld [vmem:[#allocation3 + $0x24] sm:$0xf]  ;;  %v352_v31 = vld [vmem:[#allocation3 + $0x28] sm:$0xf0]  ;;  %v351_v32 = vor.u32 %v425_v29, %v350_v28  ;;  %v465_v36 = vld [vmem:[%s591_s2] ss:$0 sm:$0xff] }
  0x16   :  { %452 = vmatpush.bf16.msra.mxu3 %v439_v5  ;;  %253 = vmatpush.bf16.msra.mxu1 %v439_v5  ;;  %v355_v33 = vor.u32 %v424_v30, %v352_v31  ;;  %s550_s2 = smov [#allocation8]  }
  0x17   :  { %s316_s26 = sshll.u32 %s550_s2, 4  ;;  %s317_s26 = int_to_ptr.vmem [resolvable:$true] %s316_s26 }
  0x19   :  { %445 = vmatpush.bf16.msra.mxu2 %v430_v6  ;;  %230 = vmatpush.bf16.msra.mxu0 %v430_v6 }
  0x1a   :  { %453 = vmatpush.bf16.msra.mxu3 %v438_v7  ;;  %254 = vmatpush.bf16.msra.mxu1 %v438_v7 }
  0x1d   :  { %446 = vmatpush.bf16.msra.mxu2 %v429_v8  ;;  %231 = vmatpush.bf16.msra.mxu0 %v429_v8 }
  0x1e   :  { %454 = vmatpush.bf16.msra.mxu3 %v437_v9  ;;  %255 = vmatpush.bf16.msra.mxu1 %v437_v9 }
  0x21   :  { %447 = vmatpush.bf16.msra.mxu2 %v428_v10  ;;  %232 = vmatpush.bf16.msra.mxu0 %v428_v10 }
  0x22   :  { %455 = vmatpush.bf16.msra.mxu3 %v436_v11  ;;  %256 = vmatpush.bf16.msra.mxu1 %v436_v11 }
  0x25   :  { %448 = vmatpush.bf16.msra.mxu2 %v427_v12  ;;  %233 = vmatpush.bf16.msra.mxu0 %v427_v12 }
  0x26   :  { %456 = vmatpush.bf16.msra.mxu3 %v435_v13  ;;  %257 = vmatpush.bf16.msra.mxu1 %v435_v13 }
  0x29   :  { %449 = vmatpush.bf16.msra.mxu2 %v426_v14  ;;  %234 = vmatpush.bf16.msra.mxu0 %v426_v14 }
  0x2a   :  { %457 = vmatpush.bf16.msra.mxu3 %v434_v15  ;;  %258 = vmatpush.bf16.msra.mxu1 %v434_v15 }
  0x2c   :  { %240 = vmatmul.bf16.vlgmr.msra.gmra.mxu2 %v343_v24  ;;  %235 = vmatmul.bf16.vlgmr.msra.gmra.mxu0 %v335_v26 }
  0x2d   :  { %264 = vmatmul.bf16.vlgmr.msra.gmra.mxu3 %v347_v25  ;;  %259 = vmatmul.bf16.vlgmr.msra.gmra.mxu1 %v339_v27 }
  0x3c   :  { %245 = vmatmul.bf16.gmra.mxu2 %v351_v32 }
  0x3d   :  { %269 = vmatmul.bf16.gmra.mxu3 %v355_v33 }
  0xa9   :  { %v236_v34 = vpop.f32.mrf.mxu0 }
  0xaa   :  { %v260_v35 = vpop.f32.mrf.mxu1 }
  0xab   :  { %v261_v37 = vadd.f32 %v260_v35, %v236_v34 }
  0xad   :  { %v300_v38 = vadd.f32 %v465_v36, %v261_v37 }
  0xaf   :  { %v241_v39 = vpop.f32.mrf.mxu2  ;;  %306 = vst [vmem:[#allocation8] sm:$0xff] %v300_v38 }
  0xb0   :  { %v265_v40 = vpop.f32.mrf.mxu3 }
  0xb1   :  { %v266_v41 = vadd.f32 %v265_v40, %v241_v39  ;;  %v238_v43 = vpop.f32.mrf.mxu0 }
  0xb2   :  { %v262_v44 = vpop.f32.mrf.mxu1 }
  0xb3   :  { %v302_v42 = vadd.f32 %v465_v36, %v266_v41  ;;  %v263_v45 = vadd.f32 %v262_v44, %v238_v43 }
  0xb5   :  { %308 = vst [vmem:[#allocation8 + $0x10] sm:$0xff] %v302_v42  ;;  %v301_v46 = vadd.f32 %v465_v36, %v263_v45 }
  0xb7   :  { %v243_v47 = vpop.f32.mrf.mxu2  ;;  %307 = vst [vmem:[#allocation8 + $0x8] sm:$0xff] %v301_v46 }
  0xb8   :  { %v267_v48 = vpop.f32.mrf.mxu3 }
  0xb9   :  { %v268_v49 = vadd.f32 %v267_v48, %v243_v47 }
  0xbb   :  { %v303_v50 = vadd.f32 %v465_v36, %v268_v49 }
  0xbd   :  { %309 = vst [vmem:[#allocation8 + $0x18] sm:$0xff] %v303_v50 }
  0xbf   :  { %v246_v51 = vpop.f32.mrf.mxu2 }
  0xc0   :  { %v270_v52 = vpop.f32.mrf.mxu3 }
  0xc1   :  { %v271_v53 = vadd.f32 %v270_v52, %v246_v51 }
  0xc3   :  { %v304_v54 = vadd.f32 %v465_v36, %v271_v53 }
  0xc5   :  { %310 = vst [vmem:[#allocation8 + $0x20] sm:$0xff] %v304_v54 }
  0xc7   :  { %v248_v55 = vpop.f32.mrf.mxu2 }
  0xc8   :  { %v272_v56 = vpop.f32.mrf.mxu3 }
  0xc9   :  { %v273_v57 = vadd.f32 %v272_v56, %v248_v55 }
  0xcb   :  { %v305_v58 = vadd.f32 %v465_v36, %v273_v57 }
  0xcd   :  { %311 = vst [vmem:[#allocation8 + $0x28] sm:$0xff] %v305_v58 }
  0xce   :  { %324 = dma.vmem_to_hbm [thread:$0]  %s317_s26, 768, %s319_s29, [#allocation5], %s545_s20, %s545_s20, %s546_s21  }
  0xcf   :  { %542 = dma.done.wait [#allocation5], 768  }
  0xd0   :  { %543 = vsyncadd [#allocation5], 4294966528 }
  0xd1   :  { %329 = vsyncpa [#allocation4], 1 }
  0xd2   :  { %330 = vsyncpa [#allocation7], 1 }
  0xd3   :  { %331 = vsyncpa [#allocation5], 1 }

</bundles_post_ra>
